<compile_context>
chip_gen: v7x
topology: tpu7x:2x2x1
jax: 0.10.0
libtpu: 0.0.40
codegen_flags: <defaults>
</compile_context>

<pallas_src>
import jax
import jax.numpy as jnp
from jax.experimental import pallas as pl
from jax.experimental.pallas import tpu as pltpu


def _repadapter_kernel(x_ref, w_ref, b_ref, o_ref):
    # x_ref: (tm, C)   w_ref: (C, C) adapter weight   b_ref: (1, C) f32   o_ref: (tm, C)
    x = x_ref[...]
    # Adapter branch on the MXU (bf16 by default), accumulated in f32.
    delta = jnp.dot(x.astype(w_ref.dtype), w_ref[...],
                    preferred_element_type=jnp.float32)
    # Residual stays outside the GEMM: exact, one cheap VPU add.
    o_ref[...] = (x.astype(jnp.float32) + delta + b_ref[...]).astype(o_ref.dtype)


def fold_repadapter_params(wa, ba, wb, bb, *, groups, scale, mxu_dtype=jnp.bfloat16):
    """Fold conv_A + (eval-mode) dropout + grouped conv_B + scale into one affine map.

    wa: (hidden, C, 1)  ba: (hidden,)  wb: (C, hidden//groups, 1)  bb: (C,)
    Returns (w_adapter: (C, C) in mxu_dtype, b_eff: (1, C) f32).
    Weights are static per layer: call this once at load time, not per forward.
    """
    hidden, C, _ = wa.shape
    hpg, opg = hidden // groups, C // groups

    wa2d = wa[:, :, 0].astype(jnp.float32).T                         # (C, hidden)
    # block-diagonal matrix expressing the grouped conv_B: (hidden, C)
    blocks = jnp.transpose(
        wb[:, :, 0].astype(jnp.float32).reshape(groups, opg, hpg), (0, 2, 1))  # (g, hpg, opg)
    eye_g = jnp.eye(groups, dtype=jnp.float32)
    wb_bd = (eye_g[:, None, :, None] * blocks[:, :, None, :]).reshape(hidden, C)

    w_adapter = (scale * (wa2d @ wb_bd)).astype(mxu_dtype)           # (C, C)
    b_eff = scale * (ba.astype(jnp.float32)[None, :] @ wb_bd
                     + bb.astype(jnp.float32)[None, :])              # (1, C) f32
    return w_adapter, b_eff


def _pick_tile(M, C, x_itemsize, w_itemsize, tm_desired):
    # ---- generation-aware VMEM budget (v5e/v6e: 128 MiB, v7x: 64 MiB per TensorCore) ----
    try:
        vmem_cap = int(pltpu.get_tpu_info().vmem_capacity_bytes)
    except Exception:                       # info unavailable -> assume smallest (v7x per-TC)
        vmem_cap = 64 * 1024 * 1024
    vmem_budget = vmem_cap // 3             # ~21 MiB on v7x, ~42 MiB on v5e/v6e
    vmem_limit = max(32 * 1024 * 1024, vmem_cap // 2)

    # weight + bias are grid-invariant (constant index_map -> fetched once) but the
    # pipeline still allocates them double-buffered, so charge them 2x.
    fixed = 2 * (C * C * w_itemsize + C * 4)
    # per row: x tile + out tile (double-buffered) + in-kernel cast / f32 accumulator temps
    per_row = 4 * C * x_itemsize + C * w_itemsize + 8 * C

    sub = max(8, 32 // x_itemsize)          # dtype-native sublane multiple (8 f32 / 16 bf16 / 32 i8)
    tm_cap = max(sub, (vmem_budget - fixed) // per_row)
    tm = int(min(tm_desired, tm_cap))
    tm = max(sub, (tm // sub) * sub)

    grid = pl.cdiv(M, tm)
    # v7x megacore: keep the tile count even so both TensorCores get equal work; don't
    # split tiny (decode-sized) calls that fit in one tile (1-TC chips gain nothing).
    if grid == 1 and M > 4096:
        grid = 2
    elif grid > 1 and grid % 2:
        grid += 1
    tm = pl.cdiv(M, grid)
    tm = max(sub, ((tm + sub - 1) // sub) * sub)
    grid = pl.cdiv(M, tm)
    return tm, grid, vmem_limit


def repadapter1d_apply(x, w_adapter, b_eff, *, tm_desired=8192):
    """x: (B, L, C) channels-last; w_adapter: (C, C); b_eff: (1, C) f32."""
    B, L, C = x.shape
    dtype = x.dtype
    x_item = jnp.dtype(dtype).itemsize
    w_item = jnp.dtype(w_adapter.dtype).itemsize

    # channels-last 2-D slab; the input is already (B, L, C) so this reshape is free
    x2d = x.reshape(B * L, C)
    M = B * L
    b_eff = jnp.asarray(b_eff, jnp.float32).reshape(1, C)

    tm, grid, vmem_limit = _pick_tile(M, C, x_item, w_item, tm_desired)

    cost = pl.CostEstimate(
        flops=2 * M * C * C,
        transcendentals=0,
        bytes_accessed=2 * M * C * x_item + C * C * w_item + C * 4,
    )

    out2d = pl.pallas_call(
        _repadapter_kernel,
        out_shape=jax.ShapeDtypeStruct((M, C), dtype),
        grid_spec=pltpu.PrefetchScalarGridSpec(
            num_scalar_prefetch=0,
            grid=(grid,),
            in_specs=[
                pl.BlockSpec((tm, C), lambda i: (i, 0)),   # x tile (lane-dense, C last)
                pl.BlockSpec((C, C), lambda i: (0, 0)),    # adapter weight (grid-invariant)
                pl.BlockSpec((1, C), lambda i: (0, 0)),    # fused bias (grid-invariant)
            ],
            out_specs=pl.BlockSpec((tm, C), lambda i: (i, 0)),
        ),
        compiler_params=pltpu.CompilerParams(
            dimension_semantics=("parallel",),
            vmem_limit_bytes=int(vmem_limit),
        ),
        cost_estimate=cost,
    )(x2d, w_adapter, b_eff)

    # no pad / no slice: ragged M is a partial last block (OOB rows never written back;
    # each output row depends only on its own input row — keep it that way).
    return out2d.reshape(B, L, C)


def repadapter1d_forward(x, wa, ba, wb, bb, *, groups, scale,
                         mxu_dtype=jnp.bfloat16, tm_desired=8192):
    """Convenience wrapper: fold + apply.  In real use, fold once per layer at load time."""
    w_adapter, b_eff = fold_repadapter_params(
        wa, ba, wb, bb, groups=groups, scale=scale, mxu_dtype=mxu_dtype)
    return repadapter1d_apply(x, w_adapter, b_eff, tm_desired=tm_desired)


def _reference(x, wa, ba, wb, bb, *, groups, scale):
    """Pure-JAX reference mirroring the PyTorch forward (eval mode), all f32."""
    B, L, C = x.shape
    hidden = wa.shape[0]
    x2d = x.reshape(-1, C).astype(jnp.float32)
    h = x2d @ wa[:, :, 0].T.astype(jnp.float32) + ba.astype(jnp.float32)
    hpg, opg = hidden // groups, C // groups
    parts = []
    for g in range(groups):
        wg = wb[g * opg:(g + 1) * opg, :, 0].astype(jnp.float32)     # (opg, hpg)
        parts.append(h[:, g * hpg:(g + 1) * hpg] @ wg.T)
    y = jnp.concatenate(parts, axis=-1) + bb.astype(jnp.float32)
    out = (x2d + scale * y).astype(x.dtype)
    return out.reshape(B, L, C)


if __name__ == "__main__":
    key = jax.random.PRNGKey(0)

    # small shapes consistent with the module (1-D tokens, channels-last input)
    B, L, C_in = 2, 128, 256
    hidden_dim, groups, scale = 8, 2, 1.0

    k_x, k_wa, k_wb = jax.random.split(key, 3)
    x = jax.random.normal(k_x, (B, L, C_in), dtype=jnp.float32)

    # --- module-faithful deterministic init ---
    bound_a = (6.0 / (C_in + hidden_dim)) ** 0.5                      # xavier_uniform
    wa = jax.random.uniform(k_wa, (hidden_dim, C_in, 1),
                            minval=-bound_a, maxval=bound_a, dtype=jnp.float32)
    ba = jnp.zeros((hidden_dim,), dtype=jnp.float32)
    wb0 = jnp.zeros((C_in, hidden_dim // groups, 1), dtype=jnp.float32)   # zeros_ init
    bb0 = jnp.zeros((C_in,), dtype=jnp.float32)

    # 1) zero-init conv_B: adapter must be exactly the identity (default bf16 MXU path)
    out = repadapter1d_forward(x, wa, ba, wb0, bb0, groups=groups, scale=scale)
    jax.block_until_ready(out)
    assert jnp.allclose(out, x, atol=1e-6), "zero-init adapter must be identity"
    assert jnp.allclose(out, _reference(x, wa, ba, wb0, bb0, groups=groups, scale=scale),
                        atol=1e-6)

    # non-trivial conv_B weights / bias
    wb_rand = jax.random.normal(k_wb, (C_in, hidden_dim // groups, 1),
                                dtype=jnp.float32) * 0.05
    bb_rand = jnp.arange(C_in, dtype=jnp.float32) * 0.01
    ref = _reference(x, wa, ba, wb_rand, bb_rand, groups=groups, scale=scale)

    # 2) exact f32 adapter path — tight check of the fold algebra
    out_f32 = repadapter1d_forward(x, wa, ba, wb_rand, bb_rand, groups=groups,
                                   scale=scale, mxu_dtype=jnp.float32)
    jax.block_until_ready(out_f32)
    assert jnp.allclose(out_f32, ref, atol=1e-4, rtol=1e-4)

    # 3) default bf16-MXU adapter path — residual stays exact f32, small delta quantized
    out_bf = repadapter1d_forward(x, wa, ba, wb_rand, bb_rand, groups=groups, scale=scale)
    jax.block_until_ready(out_bf)
    assert jnp.allclose(out_bf, ref, atol=5e-2)

    # 4) ragged M (partial last block, no padding) with a different scale
    x3 = jax.random.normal(k_x, (3, 37, C_in), dtype=jnp.float32)
    out3 = repadapter1d_forward(x3, wa, ba, wb_rand, bb_rand, groups=groups,
                                scale=0.5, mxu_dtype=jnp.float32)
    jax.block_until_ready(out3)
    ref3 = _reference(x3, wa, ba, wb_rand, bb_rand, groups=groups, scale=0.5)
    assert jnp.allclose(out3, ref3, atol=1e-4, rtol=1e-4)

    # 5) bf16 activations (exercises the 16-row sublane multiple and bf16 output cast)
    xb = x.astype(jnp.bfloat16)
    outb = repadapter1d_forward(xb, wa, ba, wb_rand, bb_rand, groups=groups, scale=scale)
    jax.block_until_ready(outb)
    refb = _reference(xb.astype(jnp.float32), wa, ba, wb_rand, bb_rand,
                      groups=groups, scale=scale)
    assert jnp.allclose(outb.astype(jnp.float32), refb, atol=1e-1)

    print("KERNEL_OK")
</pallas_src>

<mosaic_0001>
module attributes {stable_mosaic.version = 11 : i64} {
  func.func @_repadapter_kernel(%arg0: i32, %arg1: memref<256x256xf32, #tpu.memory_space<vmem>>, %arg2: memref<256x256xbf16, #tpu.memory_space<vmem>>, %arg3: memref<1x256xf32, #tpu.memory_space<vmem>>, %arg4: memref<256x256xf32, #tpu.memory_space<vmem>>) attributes {dimension_semantics = [#tpu.dimension_semantics<parallel>], iteration_bounds = array<i64: 1>, scalar_prefetch = 0 : i64, scratch_operands = 0 : i64, tpu.core_type = #tpu.core_type<tc>, window_params = [{transform_indices = @transform_0, window_bounds = array<i64: 256, 256>}, {pipeline_mode = #tpu.pipeline_mode<synchronous>, transform_indices = @transform_1, window_bounds = array<i64: 256, 256>}, {pipeline_mode = #tpu.pipeline_mode<synchronous>, transform_indices = @transform_2, window_bounds = array<i64: 1, 256>}, {transform_indices = @transform_3, window_bounds = array<i64: 256, 256>}]} {
    %c0 = arith.constant 0 : index
    %c0_0 = arith.constant 0 : index
    %0 = vector.load %arg1[%c0, %c0_0] : memref<256x256xf32, #tpu.memory_space<vmem>>, vector<256x256xf32>
    %1 = arith.truncf %0 : vector<256x256xf32> to vector<256x256xbf16>
    %c0_1 = arith.constant 0 : index
    %c0_2 = arith.constant 0 : index
    %2 = vector.load %arg2[%c0_1, %c0_2] : memref<256x256xbf16, #tpu.memory_space<vmem>>, vector<256x256xbf16>
    %cst = arith.constant dense<0.000000e+00> : vector<256x256xf32>
    %3 = tpu.matmul %1, %2, %cst {dimension_numbers = #tpu.dot_dimension_numbers<[1], [0], [0], [1], [0, 0, 1, 1], [], []>} : vector<256x256xbf16>, vector<256x256xbf16>, vector<256x256xf32> -> vector<256x256xf32>
    %4 = arith.addf %0, %3 : vector<256x256xf32>
    %c0_3 = arith.constant 0 : index
    %c0_4 = arith.constant 0 : index
    %5 = vector.load %arg3[%c0_3, %c0_4] : memref<1x256xf32, #tpu.memory_space<vmem>>, vector<1x256xf32>
    %6 = vector.broadcast %5 : vector<1x256xf32> to vector<256x256xf32>
    %7 = arith.addf %4, %6 : vector<256x256xf32>
    %c0_5 = arith.constant 0 : index
    %c0_6 = arith.constant 0 : index
    %8 = vector.load %arg4[%c0_5, %c0_6] : memref<256x256xf32, #tpu.memory_space<vmem>>, vector<256x256xf32>
    tpu.vector_store %arg4[%c0_5, %c0_6], %7 {strides = array<i32>} : memref<256x256xf32, #tpu.memory_space<vmem>>, vector<256x256xf32>,
    return
  }
  func.func @transform_0(%arg0: i32) -> (i32, i32) {
    %c0_i32 = arith.constant 0 : i32
    %c0_i32_0 = arith.constant 0 : i32
    return %arg0, %c0_i32 : i32, i32
  }
  func.func @transform_1(%arg0: i32) -> (i32, i32) {
    %c0_i32 = arith.constant 0 : i32
    %c0_i32_0 = arith.constant 0 : i32
    %c0_i32_1 = arith.constant 0 : i32
    return %c0_i32, %c0_i32_0 : i32, i32
  }
  func.func @transform_2(%arg0: i32) -> (i32, i32) {
    %c0_i32 = arith.constant 0 : i32
    %c0_i32_0 = arith.constant 0 : i32
    %c0_i32_1 = arith.constant 0 : i32
    return %c0_i32, %c0_i32_0 : i32, i32
  }
  func.func @transform_3(%arg0: i32) -> (i32, i32) {
    %c0_i32 = arith.constant 0 : i32
    %c0_i32_0 = arith.constant 0 : i32
    return %arg0, %c0_i32 : i32, i32
  }
}

</mosaic_0001>

<bundles_post_ra>
// kernel: tpu_custom_call.1
= control target key start
LH: loop header
LB: loop body
LE: loop exit
PB: predicated region body
PF: predicated region fallthrough
CT: control target
= control target key end

     0   :  { %8 = vsyncpa [#allocation3], 0  ;;  %s1333_s0 = inlined_call_operand.hbm [shape: f32[256,256], index: 0, kind: input, shape index: {}]   ;;  %s1334_s1 = inlined_call_operand.hbm [shape: bf16[256,256], index: 1, kind: input, shape index: {}]   ;;  %s1335_s2 = inlined_call_operand.vmem [shape: f32[1,256], index: 2, kind: input, shape index: {}]   ;;  %s1336_s3 = inlined_call_operand.hbm [shape: f32[256,256], index: 3, kind: output, shape index: {}]  }
   0x1   :  { %9 = vsyncpa [#allocation6], 0 }
   0x2   :  { %10 = vsyncpa [#allocation4], 0  ;;  %s937_s12 = smov [#allocation2]   ;;  %s865_s16 = scalar_lea.hbm %s1333_s0, 8192 }
   0x3   :  { %s16_s13 = sshll.u32 %s937_s12, 4  ;;  %p866_p0 = scmp.ne.s32.totalorder %s1333_s0, %s865_s16  ;;  %s17_s13 = int_to_ptr.vmem [resolvable:$true] %s16_s13 }
   0x4   :  { %p869_p1 = scmp.lt.u32.totalorder %s865_s16, %s1333_s0 }
   0x6   :  { %p871_p2 = pnand %p869_p1, %p866_p0 }
   0x8   :  { %874 = shalt.err (!%p871_p2)
}
   0x9   :  { %s875_s21 = scalar_lea.vmem %s17_s13, 8192  ;;  %p880_p4 = scmp.lt.s32.totalorder %s17_s13, %s17_s13 }
   0xa   :  { %p876_p3 = scmp.ne.s32.totalorder %s17_s13, %s875_s21  ;;  %p881_p5 = scmp.lt.s32.totalorder %s875_s21, %s875_s21 }
   0xc   :  { %p882_p6 = por %p881_p5, %p880_p4 }
   0xe   :  { %p883_p7 = pnand %p882_p6, %p876_p3 }
  0x10   :  { %886 = shalt.err (!%p883_p7)
}
  0x11   :  { %s938_s22 = smov 256   ;;  %s939_s23 = smov 16  }
  0x12   :  { %22 = dma.hbm_to_vmem [thread:$0]  %s1333_s0, 8192, %s17_s13, [#allocation3], %s938_s22, %s938_s22, %s939_s23  }
  0x13   :  { %s940_s26 = smov [#allocation5]   ;;  %s887_s30 = scalar_lea.hbm %s1334_s1, 4096 }
  0x14   :  { %s28_s27 = sshll.u32 %s940_s26, 4  ;;  %p888_p8 = scmp.ne.s32.totalorder %s1334_s1, %s887_s30  ;;  %s29_s27 = int_to_ptr.vmem [resolvable:$true] %s28_s27 }
  0x15   :  { %p891_p9 = scmp.lt.u32.totalorder %s887_s30, %s1334_s1 }
  0x17   :  { %p893_p10 = pnand %p891_p9, %p888_p8 }
  0x19   :  { %896 = shalt.err (!%p893_p10)
}
  0x1a   :  { %s897_s8 = scalar_lea.vmem %s29_s27, 4096  ;;  %p902_p12 = scmp.lt.s32.totalorder %s29_s27, %s29_s27 }
  0x1b   :  { %p898_p11 = scmp.ne.s32.totalorder %s29_s27, %s897_s8  ;;  %p903_p13 = scmp.lt.s32.totalorder %s897_s8, %s897_s8 }
  0x1d   :  { %p904_p0 = por %p903_p13, %p902_p12 }
  0x1f   :  { %p905_p1 = pnand %p904_p0, %p898_p11 }
  0x21   :  { %908 = shalt.err (!%p905_p1)
}
  0x22   :  { %s941_s0 = smov 128   ;;  %s942_s9 = smov 8  }
  0x23   :  { %34 = dma.hbm_to_vmem [thread:$0]  %s1334_s1, 4096, %s29_s27, [#allocation6], %s941_s0, %s941_s0, %s942_s9  }
  0x24   :  { %931 = dma.done.wait [#allocation3], 8192  }
  0x25   :  { %932 = vsyncadd [#allocation3], 4294959104 }
  0x26   :  { %933 = dma.done.wait [#allocation6], 4096  }
  0x27   :  { %934 = vsyncadd [#allocation6], 4294963200  ;;  %v817_v0 = vld [vmem:[#allocation5 + $0x4] ss:$8 sps:$4 sm:$0xff]   ;;  %v819_v1 = vld [vmem:[#allocation5] ss:$8 sps:$4 sm:$0xff]  }
  0x28   :  { %331 = vmatprep.subr.bf16.mxu0 %v817_v0  ;;  %778 = vmatprep.subr.bf16.mxu1 %v817_v0  ;;  %v820_v2 = vld [vmem:[#allocation5 + $0x14] ss:$8 sps:$4 sm:$0xff]   ;;  %v822_v3 = vld [vmem:[#allocation5 + $0x10] ss:$8 sps:$4 sm:$0xff]   ;;  %v823_v4 = vld [vmem:[#allocation5 + $0x24] ss:$8 sps:$4 sm:$0xff]  }
  0x29   :  { %332 = vmatpush1.bf16.msra.mxu0 %v819_v1  ;;  %794 = vmatpush1.bf16.msra.mxu1 %v819_v1  ;;  %v825_v5 = vld [vmem:[#allocation5 + $0x20] ss:$8 sps:$4 sm:$0xff]   ;;  %v826_v6 = vld [vmem:[#allocation5 + $0x34] ss:$8 sps:$4 sm:$0xff]   ;;  %v828_v7 = vld [vmem:[#allocation5 + $0x30] ss:$8 sps:$4 sm:$0xff]  }
  0x2a   :  { %333 = vmatprep.subr.bf16.mxu0 %v820_v2  ;;  %779 = vmatprep.subr.bf16.mxu1 %v820_v2  ;;  %v829_v8 = vld [vmem:[#allocation5 + $0x44] ss:$8 sps:$4 sm:$0xff]   ;;  %v831_v9 = vld [vmem:[#allocation5 + $0x40] ss:$8 sps:$4 sm:$0xff]   ;;  %v832_v10 = vld [vmem:[#allocation5 + $0x54] ss:$8 sps:$4 sm:$0xff]  }
  0x2b   :  { %v834_v11 = vld [vmem:[#allocation5 + $0x50] ss:$8 sps:$4 sm:$0xff]   ;;  %v835_v12 = vld [vmem:[#allocation5 + $0x64] ss:$8 sps:$4 sm:$0xff]   ;;  %v837_v18 = vld [vmem:[#allocation5 + $0x60] ss:$8 sps:$4 sm:$0xff]  }
  0x2c   :  { %v991_v13 = vld [vmem:[#allocation2 + $0x8] sm:$0xff]  ;;  %v993_v14 = vld [vmem:[#allocation2 + $0x18] sm:$0xff]  ;;  %v1003_v38 = vld [vmem:[#allocation2] sm:$0xff] }
  0x2d   :  { %334 = vmatpush1.bf16.msra.mxu0 %v822_v3  ;;  %795 = vmatpush1.bf16.msra.mxu1 %v822_v3  ;;  %v108_v15 = vpack.c.bf16 %v993_v14, %v991_v13  ;;  %v997_v16 = vld [vmem:[#allocation2 + $0x108] sm:$0xff]  ;;  %v999_v17 = vld [vmem:[#allocation2 + $0x118] sm:$0xff]  ;;  %v1005_v39 = vld [vmem:[#allocation2 + $0x10] sm:$0xff] }
  0x2e   :  { %335 = vmatprep.subr.bf16.mxu0 %v823_v4  ;;  %780 = vmatprep.subr.bf16.mxu1 %v823_v4  ;;  %v124_v19 = vpack.c.bf16 %v999_v17, %v997_v16  ;;  %v838_v20 = vld [vmem:[#allocation5 + $0x74] ss:$8 sps:$4 sm:$0xff]   ;;  %v840_v21 = vld [vmem:[#allocation5 + $0x70] ss:$8 sps:$4 sm:$0xff]   ;;  %v841_v22 = vld [vmem:[#allocation5 + $0x84] ss:$8 sps:$4 sm:$0xff]   ;;  %v107_v46 = vpack.c.bf16 %v1005_v39, %v1003_v38 }
  0x2f   :  { %363 = vmatprep.mubr.bf16.mxu0 %v108_v15  ;;  %v843_v23 = vld [vmem:[#allocation5 + $0x80] ss:$8 sps:$4 sm:$0xff]   ;;  %v844_v24 = vld [vmem:[#allocation5 + $0x94] ss:$8 sps:$4 sm:$0xff]   ;;  %v846_v25 = vld [vmem:[#allocation5 + $0x90] ss:$8 sps:$4 sm:$0xff]  }
  0x30   :  { %443 = vmatprep.mubr.bf16.mxu1 %v124_v19  ;;  %v847_v26 = vld [vmem:[#allocation5 + $0xa4] ss:$8 sps:$4 sm:$0xff]   ;;  %v849_v27 = vld [vmem:[#allocation5 + $0xa0] ss:$8 sps:$4 sm:$0xff]   ;;  %v850_v28 = vld [vmem:[#allocation5 + $0xb4] ss:$8 sps:$4 sm:$0xff]  }
  0x31   :  { %336 = vmatpush1.bf16.msra.mxu0 %v825_v5  ;;  %796 = vmatpush1.bf16.msra.mxu1 %v825_v5  ;;  %v852_v29 = vld [vmem:[#allocation5 + $0xb0] ss:$8 sps:$4 sm:$0xff]   ;;  %v853_v30 = vld [vmem:[#allocation5 + $0xc4] ss:$8 sps:$4 sm:$0xff]   ;;  %v855_v31 = vld [vmem:[#allocation5 + $0xc0] ss:$8 sps:$4 sm:$0xff]  }
  0x32   :  { %337 = vmatprep.subr.bf16.mxu0 %v826_v6  ;;  %781 = vmatprep.subr.bf16.mxu1 %v826_v6  ;;  %v856_v32 = vld [vmem:[#allocation5 + $0xd4] ss:$8 sps:$4 sm:$0xff]   ;;  %v858_v33 = vld [vmem:[#allocation5 + $0xd0] ss:$8 sps:$4 sm:$0xff]   ;;  %v859_v34 = vld [vmem:[#allocation5 + $0xe4] ss:$8 sps:$4 sm:$0xff]  }
  0x33   :  { %v861_v35 = vld [vmem:[#allocation5 + $0xe0] ss:$8 sps:$4 sm:$0xff]   ;;  %v862_v36 = vld [vmem:[#allocation5 + $0xf4] ss:$8 sps:$4 sm:$0xff]   ;;  %v864_v37 = vld [vmem:[#allocation5 + $0xf0] ss:$8 sps:$4 sm:$0xff]  }
  0x34   :  { %v1007_v40 = vld [vmem:[#allocation2 + $0x100] sm:$0xff]  ;;  %v1009_v41 = vld [vmem:[#allocation2 + $0x110] sm:$0xff]  ;;  %v1011_v42 = vld [vmem:[#allocation2 + $0x28] sm:$0xff] }
  0x35   :  { %338 = vmatpush1.bf16.msra.mxu0 %v828_v7  ;;  %797 = vmatpush1.bf16.msra.mxu1 %v828_v7  ;;  %v1013_v43 = vld [vmem:[#allocation2 + $0x38] sm:$0xff]  ;;  %v1015_v44 = vld [vmem:[#allocation2 + $0x128] sm:$0xff]  ;;  %v123_v47 = vpack.c.bf16 %v1009_v41, %v1007_v40  ;;  %v1027_v50 = vld [vmem:[#allocation2 + $0x20] sm:$0xff] }
  0x36   :  { %339 = vmatprep.subr.bf16.mxu0 %v829_v8  ;;  %782 = vmatprep.subr.bf16.mxu1 %v829_v8  ;;  %v1017_v45 = vld [vmem:[#allocation2 + $0x138] sm:$0xff]  ;;  %v110_v48 = vpack.c.bf16 %v1013_v43, %v1011_v42  ;;  %v1029_v51 = vld [vmem:[#allocation2 + $0x30] sm:$0xff]  ;;  %v1031_v52 = vld [vmem:[#allocation2 + $0x120] sm:$0xff] }
  0x37   :  { %v126_v49 = vpack.c.bf16 %v1017_v45, %v1015_v44  ;;  %v1033_v53 = vld [vmem:[#allocation2 + $0x130] sm:$0xff]  ;;  %v1035_v54 = vld [vmem:[#allocation2 + $0x48] sm:$0xff]  ;;  %v1037_v55 = vld [vmem:[#allocation2 + $0x58] sm:$0xff]  ;;  %v109_v58 = vpack.c.bf16 %v1029_v51, %v1027_v50 }
  0x38   :  { %v1039_v56 = vld [vmem:[#allocation2 + $0x148] sm:$0xff]  ;;  %v1041_v57 = vld [vmem:[#allocation2 + $0x158] sm:$0xff]  ;;  %v125_v59 = vpack.c.bf16 %v1033_v53, %v1031_v52  ;;  %v112_v60 = vpack.c.bf16 %v1037_v55, %v1035_v54  ;;  %v1051_v62 = vld [vmem:[#allocation2 + $0x40] sm:$0xff] }
  0x39   :  { %340 = vmatpush1.bf16.msra.mxu0 %v831_v9  ;;  %798 = vmatpush1.bf16.msra.mxu1 %v831_v9  ;;  %v128_v61 = vpack.c.bf16 %v1041_v57, %v1039_v56  ;;  %v1053_v63 = vld [vmem:[#allocation2 + $0x50] sm:$0xff]  ;;  %v1055_v0 = vld [vmem:[#allocation2 + $0x140] sm:$0xff]  ;;  %v1059_v2 = vld [vmem:[#allocation2 + $0x68] sm:$0xff] }
  0x3a   :  { %341 = vmatprep.subr.bf16.mxu0 %v832_v10  ;;  %783 = vmatprep.subr.bf16.mxu1 %v832_v10  ;;  %v1057_v1 = vld [vmem:[#allocation2 + $0x150] sm:$0xff]  ;;  %v1061_v3 = vld [vmem:[#allocation2 + $0x78] sm:$0xff]  ;;  %v1063_v4 = vld [vmem:[#allocation2 + $0x168] sm:$0xff]  ;;  %v111_v6 = vpack.c.bf16 %v1053_v63, %v1051_v62 }
  0x3b   :  { %v1065_v5 = vld [vmem:[#allocation2 + $0x178] sm:$0xff]  ;;  %v127_v7 = vpack.c.bf16 %v1057_v1, %v1055_v0  ;;  %v114_v8 = vpack.c.bf16 %v1061_v3, %v1059_v2  ;;  %v1075_v10 = vld [vmem:[#allocation2 + $0x60] sm:$0xff]  ;;  %v1081_v15 = vld [vmem:[#allocation2 + $0x170] sm:$0xff] }
  0x3c   :  { %v130_v9 = vpack.c.bf16 %v1065_v5, %v1063_v4  ;;  %v1085_v19 = vld [vmem:[#allocation2 + $0x98] sm:$0xff] }
  0x3d   :  { %342 = vmatpush1.bf16.msra.mxu0 %v834_v11  ;;  %799 = vmatpush1.bf16.msra.mxu1 %v834_v11  ;;  %v1077_v11 = vld [vmem:[#allocation2 + $0x70] sm:$0xff] }
  0x3e   :  { %343 = vmatprep.subr.bf16.mxu0 %v835_v12  ;;  %784 = vmatprep.subr.bf16.mxu1 %v835_v12  ;;  %v1079_v12 = vld [vmem:[#allocation2 + $0x160] sm:$0xff] }
  0x41   :  { %344 = vmatpush1.bf16.msra.mxu0 %v837_v18  ;;  %800 = vmatpush1.bf16.msra.mxu1 %v837_v18  ;;  %v1083_v18 = vld [vmem:[#allocation2 + $0x88] sm:$0xff] }
  0x42   :  { %345 = vmatprep.subr.bf16.mxu0 %v838_v20  ;;  %785 = vmatprep.subr.bf16.mxu1 %v838_v20  ;;  %v1087_v20 = vld [vmem:[#allocation2 + $0x188] sm:$0xff] }
  0x45   :  { %346 = vmatpush1.bf16.msra.mxu0 %v840_v21  ;;  %801 = vmatpush1.bf16.msra.mxu1 %v840_v21  ;;  %v1089_v21 = vld [vmem:[#allocation2 + $0x198] sm:$0xff] }
  0x46   :  { %347 = vmatprep.subr.bf16.mxu0 %v841_v22  ;;  %786 = vmatprep.subr.bf16.mxu1 %v841_v22  ;;  %v113_v22 = vpack.c.bf16 %v1077_v11, %v1075_v10 }
  0x49   :  { %348 = vmatpush1.bf16.msra.mxu0 %v843_v23  ;;  %802 = vmatpush1.bf16.msra.mxu1 %v843_v23  ;;  %v129_v23 = vpack.c.bf16 %v1081_v15, %v1079_v12 }
  0x4a   :  { %349 = vmatprep.subr.bf16.mxu0 %v844_v24  ;;  %787 = vmatprep.subr.bf16.mxu1 %v844_v24  ;;  %v116_v24 = vpack.c.bf16 %v1085_v19, %v1083_v18 }
  0x4d   :  { %350 = vmatpush1.bf16.msra.mxu0 %v846_v25  ;;  %803 = vmatpush1.bf16.msra.mxu1 %v846_v25  ;;  %v132_v25 = vpack.c.bf16 %v1089_v21, %v1087_v20 }
  0x4e   :  { %351 = vmatprep.subr.bf16.mxu0 %v847_v26  ;;  %788 = vmatprep.subr.bf16.mxu1 %v847_v26  ;;  %v1099_v26 = vld [vmem:[#allocation2 + $0x80] sm:$0xff] }
  0x51   :  { %352 = vmatpush1.bf16.msra.mxu0 %v849_v27  ;;  %804 = vmatpush1.bf16.msra.mxu1 %v849_v27  ;;  %v1101_v27 = vld [vmem:[#allocation2 + $0x90] sm:$0xff] }
  0x52   :  { %353 = vmatprep.subr.bf16.mxu0 %v850_v28  ;;  %789 = vmatprep.subr.bf16.mxu1 %v850_v28  ;;  %v1103_v28 = vld [vmem:[#allocation2 + $0x180] sm:$0xff] }
  0x55   :  { %354 = vmatpush1.bf16.msra.mxu0 %v852_v29  ;;  %805 = vmatpush1.bf16.msra.mxu1 %v852_v29  ;;  %v1105_v29 = vld [vmem:[#allocation2 + $0x190] sm:$0xff] }
  0x56   :  { %355 = vmatprep.subr.bf16.mxu0 %v853_v30  ;;  %790 = vmatprep.subr.bf16.mxu1 %v853_v30  ;;  %v1107_v30 = vld [vmem:[#allocation2 + $0xa8] sm:$0xff] }
  0x59   :  { %356 = vmatpush1.bf16.msra.mxu0 %v855_v31  ;;  %806 = vmatpush1.bf16.msra.mxu1 %v855_v31  ;;  %v1109_v31 = vld [vmem:[#allocation2 + $0xb8] sm:$0xff] }
  0x5a   :  { %357 = vmatprep.subr.bf16.mxu0 %v856_v32  ;;  %791 = vmatprep.subr.bf16.mxu1 %v856_v32  ;;  %v1111_v32 = vld [vmem:[#allocation2 + $0x1a8] sm:$0xff] }
  0x5d   :  { %358 = vmatpush1.bf16.msra.mxu0 %v858_v33  ;;  %807 = vmatpush1.bf16.msra.mxu1 %v858_v33  ;;  %v1113_v33 = vld [vmem:[#allocation2 + $0x1b8] sm:$0xff] }
  0x5e   :  { %359 = vmatprep.subr.bf16.mxu0 %v859_v34  ;;  %792 = vmatprep.subr.bf16.mxu1 %v859_v34  ;;  %1354 = vst [vmem:[#allocation11_spill] sm:$0xff] %v1113_v33  ;;  %v115_v34 = vpack.c.bf16 %v1101_v27, %v1099_v26 }
  0x61   :  { %360 = vmatpush1.bf16.msra.mxu0 %v861_v35  ;;  %808 = vmatpush1.bf16.msra.mxu1 %v861_v35  ;;  %v131_v35 = vpack.c.bf16 %v1105_v29, %v1103_v28 }
  0x62   :  { %361 = vmatprep.subr.bf16.mxu0 %v862_v36  ;;  %793 = vmatprep.subr.bf16.mxu1 %v862_v36  ;;  %v118_v36 = vpack.c.bf16 %v1109_v31, %v1107_v30 }
  0x65   :  { %362 = vmatpush1.bf16.msra.mxu0 %v864_v37  ;;  %809 = vmatpush1.bf16.msra.mxu1 %v864_v37  ;;  %v134_v37 = vpack.c.bf16 %v1113_v33, %v1111_v32 }
  0x68   :  { %364 = vmatmul.mubr.bf16.vlgmr.msra.gmra.mrb[0].mxu0 %v107_v46  ;;  %444 = vmatmul.mubr.bf16.vlgmr.msra.gmra.mrb[0].mxu1 %v123_v47  ;;  %v1123_v46 = vld [vmem:[#allocation2 + $0xa0] sm:$0xff]  ;;  %v1125_v47 = vld [vmem:[#allocation2 + $0xb0] sm:$0xff] }
  0x69   :  { %373 = vmatprep.mubr.bf16.mxu0 %v110_v48  ;;  %453 = vmatprep.mubr.bf16.mxu1 %v126_v49  ;;  %v1127_v48 = vld [vmem:[#allocation2 + $0x1a0] sm:$0xff]  ;;  %v1129_v49 = vld [vmem:[#allocation2 + $0x1b0] sm:$0xff] }
  0x70   :  { %374 = vmatmul.mubr.bf16.gmra.mrb[4].mxu0 %v109_v58  ;;  %454 = vmatmul.mubr.bf16.gmra.mrb[4].mxu1 %v125_v59  ;;  %v1131_v58 = vld [vmem:[#allocation2 + $0xc8] sm:$0xff]  ;;  %v1133_v59 = vld [vmem:[#allocation2 + $0xd8] sm:$0xff] }
  0x71   :  { %383 = vmatprep.mubr.bf16.mxu0 %v112_v60  ;;  %463 = vmatprep.mubr.bf16.mxu1 %v128_v61  ;;  %1355 = vst [vmem:[#allocation12_spill] sm:$0xff] %v1131_v58  ;;  %1356 = vst [vmem:[#allocation13_spill] sm:$0xff] %v1133_v59  ;;  %v1135_v60 = vld [vmem:[#allocation2 + $0x1c8] sm:$0xff]  ;;  %v1137_v61 = vld [vmem:[#allocation2 + $0x1d8] sm:$0xff] }
  0x72   :  { %1357 = vst [vmem:[#allocation14_spill] sm:$0xff] %v1135_v60  ;;  %1358 = vst [vmem:[#allocation15_spill] sm:$0xff] %v1137_v61 }
  0x78   :  { %384 = vmatmul.mubr.bf16.gmra.mrb[8].mxu0 %v111_v6  ;;  %464 = vmatmul.mubr.bf16.gmra.mrb[8].mxu1 %v127_v7  ;;  %v117_v6 = vpack.c.bf16 %v1125_v47, %v1123_v46  ;;  %v133_v7 = vpack.c.bf16 %v1129_v49, %v1127_v48 }
  0x79   :  { %393 = vmatprep.mubr.bf16.mxu0 %v114_v8  ;;  %473 = vmatprep.mubr.bf16.mxu1 %v130_v9  ;;  %v120_v8 = vpack.c.bf16 %v1133_v59, %v1131_v58  ;;  %v136_v9 = vpack.c.bf16 %v1137_v61, %v1135_v60  ;;  %v1171_v61 = vld [vmem:[#allocation2 + $0xe0] sm:$0xff]  ;;  %v1173_v59 = vld [vmem:[#allocation2 + $0xf0] sm:$0xff] }
  0x7a   :  { %1367 = vst [vmem:[#allocation24_spill] sm:$0xff] %v1171_v61  ;;  %1368 = vst [vmem:[#allocation25_spill] sm:$0xff] %v1173_v59  ;;  %v1175_v60 = vld [vmem:[#allocation2 + $0x1e0] sm:$0xff] }
  0x7b   :  { %1369 = vst [vmem:[#allocation26_spill] sm:$0xff] %v1175_v60 }
  0x80   :  { %394 = vmatmul.mubr.bf16.gmra.mrb[12].mxu0 %v113_v22  ;;  %474 = vmatmul.mubr.bf16.gmra.mrb[12].mxu1 %v129_v23  ;;  %v1147_v22 = vld [vmem:[#allocation2 + $0xc0] sm:$0xff]  ;;  %v1149_v23 = vld [vmem:[#allocation2 + $0xd0] sm:$0xff] }
  0x81   :  { %403 = vmatprep.mubr.bf16.mxu0 %v116_v24  ;;  %483 = vmatprep.mubr.bf16.mxu1 %v132_v25  ;;  %1359 = vst [vmem:[#allocation16_spill] sm:$0xff] %v1147_v22  ;;  %1360 = vst [vmem:[#allocation17_spill] sm:$0xff] %v1149_v23  ;;  %v1151_v24 = vld [vmem:[#allocation2 + $0x1c0] sm:$0xff]  ;;  %v1153_v25 = vld [vmem:[#allocation2 + $0x1d0] sm:$0xff] }
  0x82   :  { %1361 = vst [vmem:[#allocation18_spill] sm:$0xff] %v1151_v24  ;;  %1362 = vst [vmem:[#allocation19_spill] sm:$0xff] %v1153_v25 }
  0x88   :  { %404 = vmatmul.mubr.bf16.gmra.mrb[16].mxu0 %v115_v34  ;;  %484 = vmatmul.mubr.bf16.gmra.mrb[16].mxu1 %v131_v35  ;;  %v1155_v34 = vld [vmem:[#allocation2 + $0xe8] sm:$0xff]  ;;  %v1157_v35 = vld [vmem:[#allocation2 + $0xf8] sm:$0xff] }
  0x89   :  { %413 = vmatprep.mubr.bf16.mxu0 %v118_v36  ;;  %493 = vmatprep.mubr.bf16.mxu1 %v134_v37  ;;  %1363 = vst [vmem:[#allocation20_spill] sm:$0xff] %v1155_v34  ;;  %1364 = vst [vmem:[#allocation21_spill] sm:$0xff] %v1157_v35  ;;  %v1159_v36 = vld [vmem:[#allocation2 + $0x1e8] sm:$0xff]  ;;  %v1161_v37 = vld [vmem:[#allocation2 + $0x1f8] sm:$0xff] }
  0x8a   :  { %1365 = vst [vmem:[#allocation22_spill] sm:$0xff] %v1159_v36  ;;  %1366 = vst [vmem:[#allocation23_spill] sm:$0xff] %v1161_v37 }
  0x90   :  { %414 = vmatmul.mubr.bf16.gmra.mrb[20].mxu0 %v117_v6  ;;  %494 = vmatmul.mubr.bf16.gmra.mrb[20].mxu1 %v133_v7  ;;  %v119_v6 = vpack.c.bf16 %v1149_v23, %v1147_v22  ;;  %v135_v7 = vpack.c.bf16 %v1153_v25, %v1151_v24  ;;  %v1177_v23 = vld [vmem:[#allocation2 + $0x1f0] sm:$0xff]  ;;  %v121_v25 = vpack.c.bf16 %v1173_v59, %v1171_v61 }
  0x91   :  { %423 = vmatprep.mubr.bf16.mxu0 %v120_v8  ;;  %503 = vmatprep.mubr.bf16.mxu1 %v136_v9  ;;  %v122_v8 = vpack.c.bf16 %v1157_v35, %v1155_v34  ;;  %v138_v9 = vpack.c.bf16 %v1161_v37, %v1159_v36  ;;  %1370 = vst [vmem:[#allocation27_spill] sm:$0xff] %v1177_v23 }
  0x92   :  { %v137_v35 = vpack.c.bf16 %v1177_v23, %v1175_v60 }
  0x98   :  { %424 = vmatmul.mubr.bf16.gmra.mrb[24].mxu0 %v119_v6  ;;  %504 = vmatmul.mubr.bf16.gmra.mrb[24].mxu1 %v135_v7  ;;  %v590_v6 = vlaneseq }
  0x99   :  { %433 = vmatprep.mubr.bf16.mxu0 %v122_v8  ;;  %513 = vmatprep.mubr.bf16.mxu1 %v138_v9  ;;  %v588_v8 = vld [vmem:[%s1335_s2] sm:$0x3]  ;;  %s943_s2 = smov [#allocation7]  }
  0x9a   :  { %v591_v7 = vshrl.u32 %v590_v6, 7  ;;  %s733_s13 = sshll.u32 %s943_s2, 4  ;;  %s734_s13 = int_to_ptr.vmem [resolvable:$true] %s733_s13 }
  0x9b   :  { %s909_s14 = scalar_lea.vmem %s734_s13, 8192  ;;  %p914_p3 = scmp.lt.s32.totalorder %s734_s13, %s734_s13 }
  0x9c   :  { %v592_v37 = vsub.s32 0, %v591_v7  ;;  %v596_v9 = vsub.s32 1, %v591_v7  ;;  %p910_p2 = scmp.ne.s32.totalorder %s734_s13, %s909_s14  ;;  %p915_p4 = scmp.lt.s32.totalorder %s909_s14, %s909_s14 }
  0x9e   :  { %v1186_v36 = vrot.slane %v588_v8, %v592_v37  ;;  %v1188_v24 = vrot.slane %v588_v8, %v596_v9  ;;  %p916_p5 = por %p915_p4, %p914_p3 }
  0xa0   :  { %434 = vmatmul.mubr.bf16.gmra.mrb[28].mxu0 %v121_v25  ;;  %514 = vmatmul.mubr.bf16.gmra.mrb[28].mxu1 %v137_v35  ;;  %p917_p6 = pnand %p916_p5, %p910_p2 }
 0x13b   :  { %v365_v34 = vpop.f32.mrb[0].mxu0  ;;  %v445_v58 = vpop.f32.mrb[0].mxu1 }
 0x13c   :  { %v524_v59 = vadd.f32 %v365_v34, %v1003_v38  ;;  %v556_v23 = vadd.f32 %v445_v58, %v1007_v40  ;;  %v367_v25 = vpop.f32.mrb[1].mxu0  ;;  %v447_v35 = vpop.f32.mrb[1].mxu1 }
 0x13d   :  { %v525_v6 = vadd.f32 %v367_v25, %v991_v13  ;;  %v557_v60 = vadd.f32 %v447_v35, %v997_v16  ;;  %v369_v61 = vpop.f32.mrb[2].mxu0  ;;  %v449_v22 = vpop.f32.mrb[2].mxu1 }
 0x13e   :  { %v600_v7 = vadd.f32 %v1186_v36, %v524_v59  ;;  %v632_v37 = vadd.f32 %v1186_v36, %v556_v23  ;;  %v526_v33 = vadd.f32 %v369_v61, %v1005_v39  ;;  %v558_v8 = vadd.f32 %v449_v22, %v1009_v41  ;;  %v371_v9 = vpop.f32.mrb[3].mxu0  ;;  %v451_v38 = vpop.f32.mrb[3].mxu1 }
 0x13f   :  { %v601_v40 = vadd.f32 %v1188_v24, %v525_v6  ;;  %v633_v58 = vadd.f32 %v1188_v24, %v557_v60  ;;  %v527_v13 = vadd.f32 %v371_v9, %v993_v14  ;;  %v559_v16 = vadd.f32 %v451_v38, %v999_v17 }
 0x140   :  { %664 = vst [vmem:[#allocation7] sm:$0xff] %v600_v7  ;;  %696 = vst [vmem:[#allocation7 + $0x100] sm:$0xff] %v632_v37  ;;  %v602_v59 = vadd.f32 %v1186_v36, %v526_v33  ;;  %v634_v23 = vadd.f32 %v1186_v36, %v558_v8 }
 0x141   :  { %665 = vst [vmem:[#allocation7 + $0x8] sm:$0xff] %v601_v40  ;;  %697 = vst [vmem:[#allocation7 + $0x108] sm:$0xff] %v633_v58  ;;  %v603_v39 = vadd.f32 %v1188_v24, %v527_v13  ;;  %v635_v41 = vadd.f32 %v1188_v24, %v559_v16 }
 0x142   :  { %666 = vst [vmem:[#allocation7 + $0x10] sm:$0xff] %v602_v59  ;;  %698 = vst [vmem:[#allocation7 + $0x110] sm:$0xff] %v634_v23 }
 0x143   :  { %667 = vst [vmem:[#allocation7 + $0x18] sm:$0xff] %v603_v39  ;;  %699 = vst [vmem:[#allocation7 + $0x118] sm:$0xff] %v635_v41  ;;  %v375_v60 = vpop.f32.mrb[4].mxu0  ;;  %v455_v14 = vpop.f32.mrb[4].mxu1 }
 0x144   :  { %v528_v17 = vadd.f32 %v375_v60, %v1027_v50  ;;  %v560_v61 = vadd.f32 %v455_v14, %v1031_v52  ;;  %v377_v22 = vpop.f32.mrb[5].mxu0  ;;  %v457_v33 = vpop.f32.mrb[5].mxu1 }
 0x145   :  { %v529_v34 = vadd.f32 %v377_v22, %v1011_v42  ;;  %v561_v25 = vadd.f32 %v457_v33, %v1015_v44  ;;  %v379_v35 = vpop.f32.mrb[6].mxu0  ;;  %v459_v6 = vpop.f32.mrb[6].mxu1 }
 0x146   :  { %v604_v7 = vadd.f32 %v1186_v36, %v528_v17  ;;  %v636_v37 = vadd.f32 %v1186_v36, %v560_v61  ;;  %v530_v8 = vadd.f32 %v379_v35, %v1029_v51  ;;  %v562_v9 = vadd.f32 %v459_v6, %v1033_v53  ;;  %v381_v38 = vpop.f32.mrb[7].mxu0  ;;  %v461_v50 = vpop.f32.mrb[7].mxu1 }
 0x147   :  { %v605_v52 = vadd.f32 %v1188_v24, %v529_v34  ;;  %v637_v40 = vadd.f32 %v1188_v24, %v561_v25  ;;  %v531_v42 = vadd.f32 %v381_v38, %v1013_v43  ;;  %v563_v44 = vadd.f32 %v461_v50, %v1017_v45 }
 0x148   :  { %668 = vst [vmem:[#allocation7 + $0x20] sm:$0xff] %v604_v7  ;;  %700 = vst [vmem:[#allocation7 + $0x120] sm:$0xff] %v636_v37  ;;  %v606_v58 = vadd.f32 %v1186_v36, %v530_v8  ;;  %v638_v13 = vadd.f32 %v1186_v36, %v562_v9 }
 0x149   :  { %669 = vst [vmem:[#allocation7 + $0x28] sm:$0xff] %v605_v52  ;;  %701 = vst [vmem:[#allocation7 + $0x128] sm:$0xff] %v637_v40  ;;  %v607_v51 = vadd.f32 %v1188_v24, %v531_v42  ;;  %v639_v53 = vadd.f32 %v1188_v24, %v563_v44 }
 0x14a   :  { %670 = vst [vmem:[#allocation7 + $0x30] sm:$0xff] %v606_v58  ;;  %702 = vst [vmem:[#allocation7 + $0x130] sm:$0xff] %v638_v13 }
 0x14b   :  { %671 = vst [vmem:[#allocation7 + $0x38] sm:$0xff] %v607_v51  ;;  %703 = vst [vmem:[#allocation7 + $0x138] sm:$0xff] %v639_v53  ;;  %v385_v16 = vpop.f32.mrb[8].mxu0  ;;  %v465_v43 = vpop.f32.mrb[8].mxu1 }
 0x14c   :  { %v532_v45 = vadd.f32 %v385_v16, %v1051_v62  ;;  %v564_v59 = vadd.f32 %v465_v43, %v1055_v0  ;;  %v387_v23 = vpop.f32.mrb[9].mxu0  ;;  %v467_v39 = vpop.f32.mrb[9].mxu1 }
 0x14d   :  { %v533_v41 = vadd.f32 %v387_v23, %v1035_v54  ;;  %v565_v60 = vadd.f32 %v467_v39, %v1039_v56  ;;  %v389_v14 = vpop.f32.mrb[10].mxu0  ;;  %v469_v17 = vpop.f32.mrb[10].mxu1 }
 0x14e   :  { %v608_v61 = vadd.f32 %v1186_v36, %v532_v45  ;;  %v640_v22 = vadd.f32 %v1186_v36, %v564_v59  ;;  %v534_v33 = vadd.f32 %v389_v14, %v1053_v63  ;;  %v566_v34 = vadd.f32 %v469_v17, %v1057_v1  ;;  %v391_v25 = vpop.f32.mrb[11].mxu0  ;;  %v471_v62 = vpop.f32.mrb[11].mxu1 }
 0x14f   :  { %v609_v0 = vadd.f32 %v1188_v24, %v533_v41  ;;  %v641_v35 = vadd.f32 %v1188_v24, %v565_v60  ;;  %v535_v54 = vadd.f32 %v391_v25, %v1037_v55  ;;  %v567_v56 = vadd.f32 %v471_v62, %v1041_v57 }
 0x150   :  { %672 = vst [vmem:[#allocation7 + $0x40] sm:$0xff] %v608_v61  ;;  %704 = vst [vmem:[#allocation7 + $0x140] sm:$0xff] %v640_v22  ;;  %v610_v6 = vadd.f32 %v1186_v36, %v534_v33  ;;  %v642_v7 = vadd.f32 %v1186_v36, %v566_v34 }
 0x151   :  { %673 = vst [vmem:[#allocation7 + $0x48] sm:$0xff] %v609_v0  ;;  %705 = vst [vmem:[#allocation7 + $0x148] sm:$0xff] %v641_v35  ;;  %v611_v63 = vadd.f32 %v1188_v24, %v535_v54  ;;  %v643_v1 = vadd.f32 %v1188_v24, %v567_v56 }
 0x152   :  { %674 = vst [vmem:[#allocation7 + $0x50] sm:$0xff] %v610_v6  ;;  %706 = vst [vmem:[#allocation7 + $0x150] sm:$0xff] %v642_v7 }
 0x153   :  { %675 = vst [vmem:[#allocation7 + $0x58] sm:$0xff] %v611_v63  ;;  %707 = vst [vmem:[#allocation7 + $0x158] sm:$0xff] %v643_v1  ;;  %v395_v37 = vpop.f32.mrb[12].mxu0  ;;  %v475_v55 = vpop.f32.mrb[12].mxu1 }
 0x154   :  { %v536_v57 = vadd.f32 %v395_v37, %v1075_v10  ;;  %v568_v8 = vadd.f32 %v475_v55, %v1079_v12  ;;  %v397_v9 = vpop.f32.mrb[13].mxu0  ;;  %v477_v38 = vpop.f32.mrb[13].mxu1 }
 0x155   :  { %v537_v50 = vadd.f32 %v397_v9, %v1059_v2  ;;  %v569_v52 = vadd.f32 %v477_v38, %v1063_v4  ;;  %v399_v40 = vpop.f32.mrb[14].mxu0  ;;  %v479_v42 = vpop.f32.mrb[14].mxu1 }
 0x156   :  { %v612_v44 = vadd.f32 %v1186_v36, %v536_v57  ;;  %v644_v58 = vadd.f32 %v1186_v36, %v568_v8  ;;  %v538_v13 = vadd.f32 %v399_v40, %v1077_v11  ;;  %v570_v51 = vadd.f32 %v479_v42, %v1081_v15  ;;  %v401_v53 = vpop.f32.mrb[15].mxu0  ;;  %v481_v10 = vpop.f32.mrb[15].mxu1  ;;  %v1371_v42 = vld [vmem:[#allocation11_spill] sm:$0xff] }
 0x157   :  { %v613_v12 = vadd.f32 %v1188_v24, %v537_v50  ;;  %v645_v16 = vadd.f32 %v1188_v24, %v569_v52  ;;  %v539_v2 = vadd.f32 %v401_v53, %v1061_v3  ;;  %v571_v4 = vadd.f32 %v481_v10, %v1065_v5  ;;  %v1373_v10 = vld [vmem:[#allocation18_spill] sm:$0xff] }
 0x158   :  { %676 = vst [vmem:[#allocation7 + $0x60] sm:$0xff] %v612_v44  ;;  %708 = vst [vmem:[#allocation7 + $0x160] sm:$0xff] %v644_v58  ;;  %v614_v43 = vadd.f32 %v1186_v36, %v538_v13  ;;  %v646_v45 = vadd.f32 %v1186_v36, %v570_v51  ;;  %v1372_v51 = vld [vmem:[#allocation16_spill] sm:$0xff] }
 0x159   :  { %677 = vst [vmem:[#allocation7 + $0x68] sm:$0xff] %v613_v12  ;;  %709 = vst [vmem:[#allocation7 + $0x168] sm:$0xff] %v645_v16  ;;  %v615_v11 = vadd.f32 %v1188_v24, %v539_v2  ;;  %v647_v15 = vadd.f32 %v1188_v24, %v571_v4  ;;  %v1374_v4 = vld [vmem:[#allocation12_spill] sm:$0xff] }
 0x15a   :  { %678 = vst [vmem:[#allocation7 + $0x70] sm:$0xff] %v614_v43  ;;  %710 = vst [vmem:[#allocation7 + $0x170] sm:$0xff] %v646_v45  ;;  %v1375_v45 = vld [vmem:[#allocation14_spill] sm:$0xff] }
 0x15b   :  { %679 = vst [vmem:[#allocation7 + $0x78] sm:$0xff] %v615_v11  ;;  %711 = vst [vmem:[#allocation7 + $0x178] sm:$0xff] %v647_v15  ;;  %v405_v59 = vpop.f32.mrb[16].mxu0  ;;  %v485_v3 = vpop.f32.mrb[16].mxu1 }
 0x15c   :  { %v540_v5 = vadd.f32 %v405_v59, %v1099_v26  ;;  %v572_v23 = vadd.f32 %v485_v3, %v1103_v28  ;;  %v407_v39 = vpop.f32.mrb[17].mxu0  ;;  %v487_v41 = vpop.f32.mrb[17].mxu1 }
 0x15d   :  { %v541_v60 = vadd.f32 %v407_v39, %v1083_v18  ;;  %v573_v14 = vadd.f32 %v487_v41, %v1087_v20  ;;  %v409_v17 = vpop.f32.mrb[18].mxu0  ;;  %v489_v61 = vpop.f32.mrb[18].mxu1  ;;  %v1377_v41 = vld [vmem:[#allocation19_spill] sm:$0xff] }
 0x15e   :  { %v616_v22 = vadd.f32 %v1186_v36, %v540_v5  ;;  %v648_v33 = vadd.f32 %v1186_v36, %v572_v23  ;;  %v542_v34 = vadd.f32 %v409_v17, %v1101_v27  ;;  %v574_v25 = vadd.f32 %v489_v61, %v1105_v29  ;;  %v411_v62 = vpop.f32.mrb[19].mxu0  ;;  %v491_v26 = vpop.f32.mrb[19].mxu1  ;;  %v1376_v23 = vld [vmem:[#allocation17_spill] sm:$0xff] }
 0x15f   :  { %v617_v28 = vadd.f32 %v1188_v24, %v541_v60  ;;  %v649_v0 = vadd.f32 %v1188_v24, %v573_v14  ;;  %v543_v18 = vadd.f32 %v411_v62, %v1085_v19  ;;  %v575_v20 = vadd.f32 %v491_v26, %v1089_v21 }
 0x160   :  { %680 = vst [vmem:[#allocation7 + $0x80] sm:$0xff] %v616_v22  ;;  %712 = vst [vmem:[#allocation7 + $0x180] sm:$0xff] %v648_v33  ;;  %v618_v35 = vadd.f32 %v1186_v36, %v542_v34  ;;  %v650_v54 = vadd.f32 %v1186_v36, %v574_v25  ;;  %v1378_v33 = vld [vmem:[#allocation13_spill] sm:$0xff]  ;;  %v1379_v25 = vld [vmem:[#allocation15_spill] sm:$0xff] }
 0x161   :  { %681 = vst [vmem:[#allocation7 + $0x88] sm:$0xff] %v617_v28  ;;  %713 = vst [vmem:[#allocation7 + $0x188] sm:$0xff] %v649_v0  ;;  %v619_v27 = vadd.f32 %v1188_v24, %v543_v18  ;;  %v651_v29 = vadd.f32 %v1188_v24, %v575_v20 }
 0x162   :  { %682 = vst [vmem:[#allocation7 + $0x90] sm:$0xff] %v618_v35  ;;  %714 = vst [vmem:[#allocation7 + $0x190] sm:$0xff] %v650_v54  ;;  %v1380_v54 = vld [vmem:[#allocation24_spill] sm:$0xff] }
 0x163   :  { %683 = vst [vmem:[#allocation7 + $0x98] sm:$0xff] %v619_v27  ;;  %715 = vst [vmem:[#allocation7 + $0x198] sm:$0xff] %v651_v29  ;;  %v415_v56 = vpop.f32.mrb[20].mxu0  ;;  %v495_v19 = vpop.f32.mrb[20].mxu1  ;;  %v1381_v29 = vld [vmem:[#allocation26_spill] sm:$0xff] }
 0x164   :  { %v544_v21 = vadd.f32 %v415_v56, %v1123_v46  ;;  %v576_v6 = vadd.f32 %v495_v19, %v1127_v48  ;;  %v417_v7 = vpop.f32.mrb[21].mxu0  ;;  %v497_v63 = vpop.f32.mrb[21].mxu1 }
 0x165   :  { %v545_v1 = vadd.f32 %v417_v7, %v1107_v30  ;;  %v577_v37 = vadd.f32 %v497_v63, %v1111_v32  ;;  %v419_v55 = vpop.f32.mrb[22].mxu0  ;;  %v499_v57 = vpop.f32.mrb[22].mxu1  ;;  %v1383_v63 = vld [vmem:[#allocation22_spill] sm:$0xff] }
 0x166   :  { %v620_v8 = vadd.f32 %v1186_v36, %v544_v21  ;;  %v652_v9 = vadd.f32 %v1186_v36, %v576_v6  ;;  %v546_v38 = vadd.f32 %v419_v55, %v1125_v47  ;;  %v578_v50 = vadd.f32 %v499_v57, %v1129_v49  ;;  %v421_v52 = vpop.f32.mrb[23].mxu0  ;;  %v501_v46 = vpop.f32.mrb[23].mxu1  ;;  %v1382_v6 = vld [vmem:[#allocation20_spill] sm:$0xff] }
 0x167   :  { %v621_v48 = vadd.f32 %v1188_v24, %v545_v1  ;;  %v653_v40 = vadd.f32 %v1188_v24, %v577_v37  ;;  %v547_v30 = vadd.f32 %v421_v52, %v1109_v31  ;;  %v579_v32 = vadd.f32 %v501_v46, %v1371_v42  ;;  %v1386_v42 = vld [vmem:[#allocation21_spill] sm:$0xff] }
 0x168   :  { %684 = vst [vmem:[#allocation7 + $0xa0] sm:$0xff] %v620_v8  ;;  %716 = vst [vmem:[#allocation7 + $0x1a0] sm:$0xff] %v652_v9  ;;  %v622_v44 = vadd.f32 %v1186_v36, %v546_v38  ;;  %v654_v58 = vadd.f32 %v1186_v36, %v578_v50  ;;  %v1384_v9 = vld [vmem:[#allocation25_spill] sm:$0xff]  ;;  %v1385_v50 = vld [vmem:[#allocation27_spill] sm:$0xff] }
 0x169   :  { %685 = vst [vmem:[#allocation7 + $0xa8] sm:$0xff] %v621_v48  ;;  %717 = vst [vmem:[#allocation7 + $0x1a8] sm:$0xff] %v653_v40  ;;  %v623_v47 = vadd.f32 %v1188_v24, %v547_v30  ;;  %v655_v49 = vadd.f32 %v1188_v24, %v579_v32 }
 0x16a   :  { %686 = vst [vmem:[#allocation7 + $0xb0] sm:$0xff] %v622_v44  ;;  %718 = vst [vmem:[#allocation7 + $0x1b0] sm:$0xff] %v654_v58  ;;  %v1387_v44 = vld [vmem:[#allocation23_spill] sm:$0xff] }
 0x16b   :  { %687 = vst [vmem:[#allocation7 + $0xb8] sm:$0xff] %v623_v47  ;;  %719 = vst [vmem:[#allocation7 + $0x1b8] sm:$0xff] %v655_v49  ;;  %v425_v13 = vpop.f32.mrb[24].mxu0  ;;  %v505_v31 = vpop.f32.mrb[24].mxu1 }
 0x16c   :  { %v548_v53 = vadd.f32 %v425_v13, %v1372_v51  ;;  %v580_v12 = vadd.f32 %v505_v31, %v1373_v10  ;;  %v427_v16 = vpop.f32.mrb[25].mxu0  ;;  %v507_v2 = vpop.f32.mrb[25].mxu1 }
 0x16d   :  { %v549_v43 = vadd.f32 %v427_v16, %v1374_v4  ;;  %v581_v11 = vadd.f32 %v507_v2, %v1375_v45  ;;  %v429_v15 = vpop.f32.mrb[26].mxu0  ;;  %v509_v59 = vpop.f32.mrb[26].mxu1 }
 0x16e   :  { %v624_v3 = vadd.f32 %v1186_v36, %v548_v53  ;;  %v656_v5 = vadd.f32 %v1186_v36, %v580_v12  ;;  %v550_v39 = vadd.f32 %v429_v15, %v1376_v23  ;;  %v582_v60 = vadd.f32 %v509_v59, %v1377_v41  ;;  %v431_v14 = vpop.f32.mrb[27].mxu0  ;;  %v511_v17 = vpop.f32.mrb[27].mxu1 }
 0x16f   :  { %v625_v61 = vadd.f32 %v1188_v24, %v549_v43  ;;  %v657_v22 = vadd.f32 %v1188_v24, %v581_v11  ;;  %v551_v34 = vadd.f32 %v431_v14, %v1378_v33  ;;  %v583_v62 = vadd.f32 %v511_v17, %v1379_v25 }
 0x170   :  { %688 = vst [vmem:[#allocation7 + $0xc0] sm:$0xff] %v624_v3  ;;  %720 = vst [vmem:[#allocation7 + $0x1c0] sm:$0xff] %v656_v5  ;;  %v626_v26 = vadd.f32 %v1186_v36, %v550_v39  ;;  %v658_v28 = vadd.f32 %v1186_v36, %v582_v60 }
 0x171   :  { %689 = vst [vmem:[#allocation7 + $0xc8] sm:$0xff] %v625_v61  ;;  %721 = vst [vmem:[#allocation7 + $0x1c8] sm:$0xff] %v657_v22  ;;  %v627_v0 = vadd.f32 %v1188_v24, %v551_v34  ;;  %v659_v18 = vadd.f32 %v1188_v24, %v583_v62 }
 0x172   :  { %690 = vst [vmem:[#allocation7 + $0xd0] sm:$0xff] %v626_v26  ;;  %722 = vst [vmem:[#allocation7 + $0x1d0] sm:$0xff] %v658_v28 }
 0x173   :  { %691 = vst [vmem:[#allocation7 + $0xd8] sm:$0xff] %v627_v0  ;;  %723 = vst [vmem:[#allocation7 + $0x1d8] sm:$0xff] %v659_v18  ;;  %v435_v20 = vpop.f32.mrb[28].mxu0  ;;  %v515_v35 = vpop.f32.mrb[28].mxu1 }
 0x174   :  { %v552_v27 = vadd.f32 %v435_v20, %v1380_v54  ;;  %v584_v56 = vadd.f32 %v515_v35, %v1381_v29  ;;  %v437_v19 = vpop.f32.mrb[29].mxu0  ;;  %v517_v21 = vpop.f32.mrb[29].mxu1 }
 0x175   :  { %v553_v7 = vadd.f32 %v437_v19, %v1382_v6  ;;  %v585_v1 = vadd.f32 %v517_v21, %v1383_v63  ;;  %v439_v37 = vpop.f32.mrb[30].mxu0  ;;  %v519_v55 = vpop.f32.mrb[30].mxu1 }
 0x176   :  { %v628_v57 = vadd.f32 %v1186_v36, %v552_v27  ;;  %v660_v8 = vadd.f32 %v1186_v36, %v584_v56  ;;  %v554_v38 = vadd.f32 %v439_v37, %v1384_v9  ;;  %v586_v52 = vadd.f32 %v519_v55, %v1385_v50  ;;  %v441_v46 = vpop.f32.mrb[31].mxu0  ;;  %v521_v48 = vpop.f32.mrb[31].mxu1 }
 0x177   :  { %v629_v40 = vadd.f32 %v1188_v24, %v553_v7  ;;  %v661_v30 = vadd.f32 %v1188_v24, %v585_v1  ;;  %v555_v32 = vadd.f32 %v441_v46, %v1386_v42  ;;  %v587_v58 = vadd.f32 %v521_v48, %v1387_v44 }
 0x178   :  { %692 = vst [vmem:[#allocation7 + $0xe0] sm:$0xff] %v628_v57  ;;  %724 = vst [vmem:[#allocation7 + $0x1e0] sm:$0xff] %v660_v8  ;;  %v630_v47 = vadd.f32 %v1186_v36, %v554_v38  ;;  %v662_v49 = vadd.f32 %v1186_v36, %v586_v52 }
 0x179   :  { %693 = vst [vmem:[#allocation7 + $0xe8] sm:$0xff] %v629_v40  ;;  %725 = vst [vmem:[#allocation7 + $0x1e8] sm:$0xff] %v661_v30  ;;  %v631_v13 = vadd.f32 %v1188_v24, %v555_v32  ;;  %v663_v31 = vadd.f32 %v1188_v24, %v587_v58 }
 0x17a   :  { %694 = vst [vmem:[#allocation7 + $0xf0] sm:$0xff] %v630_v47  ;;  %726 = vst [vmem:[#allocation7 + $0x1f0] sm:$0xff] %v662_v49 }
 0x17b   :  { %695 = vst [vmem:[#allocation7 + $0xf8] sm:$0xff] %v631_v13  ;;  %727 = vst [vmem:[#allocation7 + $0x1f8] sm:$0xff] %v663_v31 }
 0x17c   :  { %920 = shalt.err (!%p917_p6)
}
 0x17d   :  { %s921_s17 = scalar_lea.hbm %s1336_s3, 8192 }
 0x17e   :  { %p922_p7 = scmp.ne.s32.totalorder %s1336_s3, %s921_s17  ;;  %p925_p8 = scmp.lt.u32.totalorder %s921_s17, %s1336_s3 }
 0x180   :  { %p927_p9 = pnand %p925_p8, %p922_p7 }
 0x182   :  { %930 = shalt.err (!%p927_p9)
}
 0x183   :  { %739 = dma.vmem_to_hbm [thread:$0]  %s734_s13, 8192, %s1336_s3, [#allocation4], %s938_s22, %s938_s22, %s939_s23  }
 0x184   :  { %935 = dma.done.wait [#allocation4], 8192  }
 0x185   :  { %936 = vsyncadd [#allocation4], 4294959104 }
 0x186   :  { %743 = vsyncpa [#allocation3], 1 }
 0x187   :  { %744 = vsyncpa [#allocation6], 1 }
 0x188   :  { %745 = vsyncpa [#allocation4], 1 }

</bundles_post_ra>
